<compile_context>
chip_gen: v6e
topology: v6e:2x2x1
jax: 0.10.0
libtpu: 0.0.40
codegen_flags: <defaults>
</compile_context>

<pallas_src>
import functools
import math

import jax
import jax.numpy as jnp
import numpy as np
from jax.experimental import pallas as pl
from jax.experimental.pallas import tpu as pltpu


def _round_up(x, m):
    return ((x + m - 1) // m) * m


# ----------------------------------------------------------------------------
# Kernel 1: scaled similarity matmul  sims = (emb @ feat.T) * (1 / T)
# ----------------------------------------------------------------------------
def _sims_kernel(emb_ref, feat_ref, out_ref, acc_ref, *, inv_t):
    k = pl.program_id(2)

    @pl.when(k == 0)
    def _init():
        acc_ref[...] = jnp.zeros_like(acc_ref)

    # (tm, tk) x (tn, tk) contracted over the feature dim -> (tm, tn) on the MXU.
    acc_ref[...] += jax.lax.dot_general(
        emb_ref[...], feat_ref[...],
        (((1,), (1,)), ((), ())),
        preferred_element_type=jnp.float32,
    )

    @pl.when(k == pl.num_programs(2) - 1)
    def _finalize():
        # Fold 1/T here once so the N^2 hot loop never divides by the temperature.
        out_ref[...] = acc_ref[...] * inv_t


def compute_scaled_similarities(emb, feat, inv_t, tm=128, tn=128):
    # Keep f32 operands: the sharp sigmoid temperature (e.g. 0.01) amplifies any
    # matmul error by 1/T, so bf16 inputs would visibly perturb the loss.
    L, F = emb.shape
    A, _ = feat.shape
    Lp, Ap = _round_up(L, tm), _round_up(A, tn)
    Fp = _round_up(F, 128)
    tk = 512 if Fp % 512 == 0 else (256 if Fp % 256 == 0 else 128)

    emb_p = jnp.zeros((Lp, Fp), jnp.float32).at[:L, :F].set(emb.astype(jnp.float32))
    feat_p = jnp.zeros((Ap, Fp), jnp.float32).at[:A, :F].set(feat.astype(jnp.float32))

    sims = pl.pallas_call(
        functools.partial(_sims_kernel, inv_t=inv_t),
        out_shape=jax.ShapeDtypeStruct((Lp, Ap), jnp.float32),
        grid_spec=pltpu.PrefetchScalarGridSpec(
            num_scalar_prefetch=0,
            grid=(Lp // tm, Ap // tn, Fp // tk),
            in_specs=[
                pl.BlockSpec((tm, tk), lambda i, j, k: (i, k)),
                pl.BlockSpec((tn, tk), lambda i, j, k: (j, k)),
            ],
            out_specs=pl.BlockSpec((tm, tn), lambda i, j, k: (i, j)),
            scratch_shapes=[pltpu.VMEM((tm, tn), jnp.float32)],
        ),
        compiler_params=pltpu.CompilerParams(
            dimension_semantics=("parallel", "parallel", "arbitrary")),
    )(emb_p, feat_p)
    return sims[:L, :A]


# ----------------------------------------------------------------------------
# Kernel 2: pairwise sigmoid rankings, row-tiled x column-tiled.
#
# For flattened, temperature-scaled sims s, pos mask p, pos_neg mask q:
#   D[j, i] = sigmoid(s[j] - s[i])
#   rpn[i]  = sum_j q[j]        * D[j, i]     (ranking_pos_neg - 1)
#   rp[i]   = sum_j q[j] * p[j] * D[j, i]     (ranking_pos     - 1)
#   num(row tile) = sum_i p[i] * (1 + rp[i]) / (1 + rpn[i])
#   loss = -( sum over row tiles of num ) / sum_i p[i]
# ----------------------------------------------------------------------------
def _pairwise_kernel(row_cnt_ref, col_cnt_ref, row_ref, col_ref, num_ref,
                     rpn_acc, rp_acc):
    ri = pl.program_id(0)
    cj = pl.program_id(1)

    @pl.when(cj == 0)
    def _init():
        rpn_acc[...] = jnp.zeros_like(rpn_acc)
        rp_acc[...] = jnp.zeros_like(rp_acc)

    # Tile-level sparsity skip: rows without positives and columns without
    # pos_neg entries contribute nothing, so skip the exp-heavy block.
    active = jnp.logical_and(row_cnt_ref[ri] > 0, col_cnt_ref[cj] > 0)

    @pl.when(active)
    def _compute():
        rb = row_ref[...]                     # (2, R): [s_i ; p_i], lane-dense
        cb = col_ref[...]                     # (C, 3): [s_j, q_j, q_j * p_j]
        si = rb[0:1, :]                       # (1, R)
        sj = cb[:, 0:1]                       # (C, 1)
        wq = cb[:, 1:2]                       # (C, 1)
        wqp = cb[:, 2:3]                      # (C, 1)
        d = jax.nn.sigmoid(sj - si)           # (C, R), already temperature-scaled
        rpn_acc[...] += jnp.sum(d * wq, axis=0, keepdims=True)    # (1, R)
        rp_acc[...] += jnp.sum(d * wqp, axis=0, keepdims=True)    # (1, R)

    @pl.when(cj == pl.num_programs(1) - 1)
    def _finalize():
        pi = row_ref[1:2, :]                  # (1, R)
        ratio = (1.0 + rp_acc[...]) * pl.reciprocal(1.0 + rpn_acc[...], approx=True)
        num_ref[...] = jnp.reshape(jnp.sum(pi * ratio), (1, 1, 1))


def vec_smooth_ap_loss(landmark_embeddings, pos_patches, pos_neg_patches,
                       patch_features, sigmoid_temperature,
                       row_tile=512, col_tile=512):
    t = float(sigmoid_temperature)
    inv_t = 1.0 / t

    sims = compute_scaled_similarities(landmark_embeddings, patch_features, inv_t)
    L, A = sims.shape
    N = L * A

    s_flat = sims.reshape(N)                                    # already * (1/T)
    p_flat = pos_patches.reshape(N).astype(jnp.float32)
    q_flat = pos_neg_patches.reshape(N).astype(jnp.float32)

    R, C = int(row_tile), int(col_tile)                         # R % 128 == 0, C % 8 == 0
    lcm = R * C // math.gcd(R, C)
    Np = _round_up(N, lcm)
    pad = Np - N
    s_pad = jnp.pad(s_flat, (0, pad))
    p_pad = jnp.pad(p_flat, (0, pad))       # padded entries: p = q = 0 -> no contribution
    q_pad = jnp.pad(q_flat, (0, pad))

    row_pack = jnp.stack([s_pad, p_pad], axis=0)                 # (2, Np)
    col_pack = jnp.stack([s_pad, q_pad, q_pad * p_pad], axis=1)  # (Np, 3)

    nrt, nct = Np // R, Np // C
    row_cnt = jnp.sum(p_pad.reshape(nrt, R) > 0, axis=1).astype(jnp.int32)
    col_cnt = jnp.sum(q_pad.reshape(nct, C) > 0, axis=1).astype(jnp.int32)

    num_partials = pl.pallas_call(
        _pairwise_kernel,
        out_shape=jax.ShapeDtypeStruct((nrt, 1, 1), jnp.float32),
        grid_spec=pltpu.PrefetchScalarGridSpec(
            num_scalar_prefetch=2,
            grid=(nrt, nct),
            in_specs=[
                pl.BlockSpec((2, R), lambda ri, cj, *_: (0, ri)),
                pl.BlockSpec((C, 3), lambda ri, cj, *_: (cj, 0)),
            ],
            out_specs=pl.BlockSpec((1, 1, 1), lambda ri, cj, *_: (ri, 0, 0)),
            scratch_shapes=[pltpu.VMEM((1, R), jnp.float32),     # rpn accumulator
                            pltpu.VMEM((1, R), jnp.float32)],    # rp  accumulator
        ),
        compiler_params=pltpu.CompilerParams(
            dimension_semantics=("parallel", "arbitrary")),
    )(row_cnt, col_cnt, row_pack, col_pack)

    def _safe_div(a, b):
        # Guard against empty masks (the PyTorch module would NaN here).
        return jnp.where(b > 0, a / jnp.maximum(b, 1.0), 0.0)

    pos_count = jnp.sum(p_flat)
    vec_smooth_ap = _safe_div(jnp.sum(num_partials), pos_count)
    loss = -vec_smooth_ap

    # O(N) logging stats; XLA fuses them into a single pass over the flat arrays.
    # Similarities were pre-scaled by 1/T, so multiply the averages back by T.
    neg_f = q_flat * (1.0 - p_flat)
    dc_f = 1.0 - q_flat
    log_dict = {
        "vec_smooth_ap": vec_smooth_ap,
        "loss": loss,
        "avg_pos_similarity": t * _safe_div(jnp.sum(s_flat * p_flat), pos_count),
        "avg_neg_similarity": t * _safe_div(jnp.sum(s_flat * neg_f), jnp.sum(neg_f)),
        "avg_dontcare_similarity": t * _safe_div(jnp.sum(s_flat * dc_f), jnp.sum(dc_f)),
    }
    return loss, log_dict


# ----------------------------------------------------------------------------
# Pure-numpy reference matching the PyTorch boolean-gather formulation.
# ----------------------------------------------------------------------------
def _reference(emb, feat, pos, posneg, temperature):
    sims = (emb.astype(np.float32) @ feat.astype(np.float32).T).reshape(-1)
    p = pos.reshape(-1)
    q = posneg.reshape(-1)
    sp = sims[p].astype(np.float64)
    sq = sims[q].astype(np.float64)
    d = 1.0 / (1.0 + np.exp(-(sq[None, :] - sp[:, None]) / temperature))
    rpn = 1.0 + d.sum(axis=1)
    rp = 1.0 + (d * p[q][None, :].astype(np.float64)).sum(axis=1)
    loss = -float((rp / rpn).mean())
    avg_pos = float(sims[p].mean())
    return loss, avg_pos


if __name__ == "__main__":
    key = jax.random.PRNGKey(0)
    k_emb, k_feat, k_pos, k_pn = jax.random.split(key, 4)

    n_landmarks, n_all_patches, feature_dim = 16, 96, 64
    sigmoid_temperature = 0.01  # config.SIGMOID_TEMPERATURE

    emb = jax.random.normal(k_emb, (n_landmarks, feature_dim), dtype=jnp.float32)
    emb = emb / jnp.linalg.norm(emb, axis=-1, keepdims=True)
    feat = jax.random.normal(k_feat, (n_all_patches, feature_dim), dtype=jnp.float32)
    feat = feat / jnp.linalg.norm(feat, axis=-1, keepdims=True)

    pos_patches = jax.random.bernoulli(k_pos, 0.25, (n_landmarks, n_all_patches))
    pos_patches = pos_patches.at[0, 0].set(True)      # guarantee at least one positive
    pos_neg_patches = jnp.logical_or(
        pos_patches, jax.random.bernoulli(k_pn, 0.5, (n_landmarks, n_all_patches)))

    loss, log_dict = vec_smooth_ap_loss(
        emb, pos_patches, pos_neg_patches, feat, sigmoid_temperature)
    jax.block_until_ready(loss)
    jax.block_until_ready(log_dict)

    ref_loss, ref_avg_pos = _reference(
        np.asarray(emb), np.asarray(feat),
        np.asarray(pos_patches), np.asarray(pos_neg_patches), sigmoid_temperature)

    # Tolerance: approx reciprocal in the finalize + f32 MXU accumulation amplified
    # by the sharp temperature => ~1e-3 relative on the loss.
    assert np.allclose(float(loss), ref_loss, rtol=1e-3, atol=1e-4), (float(loss), ref_loss)
    assert np.allclose(float(log_dict["avg_pos_similarity"]), ref_avg_pos,
                       rtol=1e-4, atol=1e-5), (
        float(log_dict["avg_pos_similarity"]), ref_avg_pos)

    # TODO(synk): exact PyTorch behaviour would NaN on empty masks; this version
    # returns 0 for the degenerate cases (safe-divide guard).

    print("KERNEL_OK")
</pallas_src>

<mosaic_0001>
module attributes {stable_mosaic.version = 11 : i64} {
  func.func @_sims_kernel(%arg0: i32, %arg1: i32, %arg2: i32, %arg3: memref<128x128xf32, #tpu.memory_space<vmem>>, %arg4: memref<128x128xf32, #tpu.memory_space<vmem>>, %arg5: memref<128x128xf32, #tpu.memory_space<vmem>>, %arg6: memref<128x128xf32, #tpu.memory_space<vmem>>) attributes {dimension_semantics = [#tpu.dimension_semantics<parallel>, #tpu.dimension_semantics<parallel>, #tpu.dimension_semantics<arbitrary>], iteration_bounds = array<i64: 1, 1, 1>, scalar_prefetch = 0 : i64, scratch_operands = 1 : i64, tpu.core_type = #tpu.core_type<tc>, window_params = [{transform_indices = @transform_0, window_bounds = array<i64: 128, 128>}, {transform_indices = @transform_1, window_bounds = array<i64: 128, 128>}, {transform_indices = @transform_2, window_bounds = array<i64: 128, 128>}]} {
    %c0_i32 = arith.constant 0 : i32
    %0 = arith.cmpi eq, %arg2, %c0_i32 : i32
    %1 = arith.extui %0 : i1 to i32
    %c0_i32_0 = arith.constant 0 : i32
    %2 = arith.cmpi ne, %1, %c0_i32_0 : i32
    scf.if %2 {
      %cst_10 = arith.constant 0.000000e+00 : f32
      %12 = vector.broadcast %cst_10 : f32 to vector<128x128xf32>
      %c0_11 = arith.constant 0 : index
      %c0_12 = arith.constant 0 : index
      %13 = vector.load %arg6[%c0_11, %c0_12] : memref<128x128xf32, #tpu.memory_space<vmem>>, vector<128x128xf32>
      tpu.vector_store %arg6[%c0_11, %c0_12], %12 {strides = array<i32>} : memref<128x128xf32, #tpu.memory_space<vmem>>, vector<128x128xf32>,
    } else {
    }
    %c0 = arith.constant 0 : index
    %c0_1 = arith.constant 0 : index
    %3 = vector.load %arg6[%c0, %c0_1] : memref<128x128xf32, #tpu.memory_space<vmem>>, vector<128x128xf32>
    %c0_2 = arith.constant 0 : index
    %c0_3 = arith.constant 0 : index
    %4 = vector.load %arg3[%c0_2, %c0_3] : memref<128x128xf32, #tpu.memory_space<vmem>>, vector<128x128xf32>
    %c0_4 = arith.constant 0 : index
    %c0_5 = arith.constant 0 : index
    %5 = vector.load %arg4[%c0_4, %c0_5] : memref<128x128xf32, #tpu.memory_space<vmem>>, vector<128x128xf32>
    %cst = arith.constant dense<0.000000e+00> : vector<128x128xf32>
    %6 = tpu.matmul %4, %5, %cst {dimension_numbers = #tpu.dot_dimension_numbers<[1], [1], [0], [0], [0, 0, 1, 0], [], []>} : vector<128x128xf32>, vector<128x128xf32>, vector<128x128xf32> -> vector<128x128xf32>
    %7 = arith.addf %3, %6 : vector<128x128xf32>
    %c0_6 = arith.constant 0 : index
    %c0_7 = arith.constant 0 : index
    %8 = vector.load %arg6[%c0_6, %c0_7] : memref<128x128xf32, #tpu.memory_space<vmem>>, vector<128x128xf32>
    tpu.vector_store %arg6[%c0_6, %c0_7], %7 {strides = array<i32>} : memref<128x128xf32, #tpu.memory_space<vmem>>, vector<128x128xf32>,
    %c0_i32_8 = arith.constant 0 : i32
    %9 = arith.cmpi eq, %arg2, %c0_i32_8 : i32
    %10 = arith.extui %9 : i1 to i32
    %c0_i32_9 = arith.constant 0 : i32
    %11 = arith.cmpi ne, %10, %c0_i32_9 : i32
    scf.if %11 {
      %c0_10 = arith.constant 0 : index
      %c0_11 = arith.constant 0 : index
      %12 = vector.load %arg6[%c0_10, %c0_11] : memref<128x128xf32, #tpu.memory_space<vmem>>, vector<128x128xf32>
      %cst_12 = arith.constant 1.000000e+02 : f32
      %13 = vector.broadcast %cst_12 : f32 to vector<128x128xf32>
      %14 = arith.mulf %12, %13 : vector<128x128xf32>
      %c0_13 = arith.constant 0 : index
      %c0_14 = arith.constant 0 : index
      %15 = vector.load %arg5[%c0_13, %c0_14] : memref<128x128xf32, #tpu.memory_space<vmem>>, vector<128x128xf32>
      tpu.vector_store %arg5[%c0_13, %c0_14], %14 {strides = array<i32>} : memref<128x128xf32, #tpu.memory_space<vmem>>, vector<128x128xf32>,
    } else {
    }
    return
  }
  func.func @transform_0(%arg0: i32, %arg1: i32, %arg2: i32) -> (i32, i32) {
    %c0_i32 = arith.constant 0 : i32
    return %arg0, %arg2 : i32, i32
  }
  func.func @transform_1(%arg0: i32, %arg1: i32, %arg2: i32) -> (i32, i32) {
    %c0_i32 = arith.constant 0 : i32
    return %arg1, %arg2 : i32, i32
  }
  func.func @transform_2(%arg0: i32, %arg1: i32, %arg2: i32) -> (i32, i32) {
    %c0_i32 = arith.constant 0 : i32
    return %arg0, %arg1 : i32, i32
  }
}

</mosaic_0001>

<bundles_post_ra>
// kernel: tpu_custom_call.1
= control target key start
LH: loop header
LB: loop body
LE: loop exit
PB: predicated region body
PF: predicated region fallthrough
CT: control target
= control target key end

     0   :  { %7 = vsyncpa [#allocation4], 0  ;;  %s583_s0 = inlined_call_operand.hbm [shape: f32[128,128], index: 0, kind: input, shape index: {}]   ;;  %s584_s1 = inlined_call_operand.hbm [shape: f32[128,128], index: 1, kind: input, shape index: {}]   ;;  %s585_s2 = inlined_call_operand.hbm [shape: f32[128,128], index: 2, kind: output, shape index: {}]  }
   0x1   :  { %8 = vsyncpa [#allocation7], 0 }
   0x2   :  { %9 = vsyncpa [#allocation5], 0  ;;  %s545_s9 = smov [#allocation3]  }
   0x3   :  { %s15_s10 = sshll.u32 %s545_s9, 4  ;;  %s16_s10 = int_to_ptr.vmem [resolvable:$true] %s15_s10 }
   0x4   :  { %s487_s11 = scalar_lea.vmem %s16_s10, 2048  ;;  %p492_p1 = scmp.lt.s32.totalorder %s16_s10, %s16_s10 }
   0x5   :  { %p488_p0 = scmp.ne.s32.totalorder %s16_s10, %s487_s11  ;;  %p493_p2 = scmp.lt.s32.totalorder %s487_s11, %s487_s11 }
   0x7   :  { %p494_p3 = por %p493_p2, %p492_p1 }
   0x9   :  { %p495_p4 = pnand %p494_p3, %p488_p0 }
   0xb   :  { %498 = shalt.err (!%p495_p4)
}
   0xc   :  { %s546_s12 = smov 128   ;;  %s547_s13 = smov 8  }
   0xd   :  { %21 = dma.hbm_to_vmem [thread:$0]  %s583_s0, 2048, %s16_s10, [#allocation4], %s546_s12, %s546_s12, %s547_s13  }
   0xe   :  { %s548_s16 = smov [#allocation6]  }
   0xf   :  { %s27_s17 = sshll.u32 %s548_s16, 4  ;;  %s28_s17 = int_to_ptr.vmem [resolvable:$true] %s27_s17 }
  0x10   :  { %s507_s18 = scalar_lea.vmem %s28_s17, 2048  ;;  %p512_p6 = scmp.lt.s32.totalorder %s28_s17, %s28_s17 }
  0x11   :  { %p508_p5 = scmp.ne.s32.totalorder %s28_s17, %s507_s18  ;;  %p513_p7 = scmp.lt.s32.totalorder %s507_s18, %s507_s18 }
  0x13   :  { %p514_p8 = por %p513_p7, %p512_p6 }
  0x15   :  { %p515_p9 = pnand %p514_p8, %p508_p5 }
  0x17   :  { %518 = shalt.err (!%p515_p9)
}
  0x18   :  { %33 = dma.hbm_to_vmem [thread:$0]  %s584_s1, 2048, %s28_s17, [#allocation7], %s546_s12, %s546_s12, %s547_s13  }
  0x19   :  { %539 = dma.done.wait [#allocation4], 2048  }
  0x1a   :  { %540 = vsyncadd [#allocation4], 4294965248 }
  0x1b   :  { %541 = dma.done.wait [#allocation7], 2048  }
  0x1c   :  { %542 = vsyncadd [#allocation7], 4294965248  ;;  %v107_v0 = vld [vmem:[#allocation6 + $0x78] sm:$0xff]  ;;  %v106_v1 = vld [vmem:[#allocation6 + $0x70] sm:$0xff]  ;;  %s549_s0 = smov [#allocation8]  }
  0x1d   :  { %386 = vmatprep.subr.mxu0 %v107_v0  ;;  %442 = vmatprep.subr.mxu1 %v107_v0  ;;  %v105_v2 = vld [vmem:[#allocation6 + $0x68] sm:$0xff]  ;;  %v76_v3 = vld [vmem:[#allocation3] sm:$0xff]  ;;  %v103_v6 = vld [vmem:[#allocation6 + $0x58] sm:$0xff]  ;;  %s341_s1 = sshll.u32 %s549_s0, 4  ;;  %s342_s1 = int_to_ptr.vmem [resolvable:$true] %s341_s1 }
  0x1e   :  { %387 = vmatpush3.xpose.msra.mxu0 %v107_v0  ;;  %458 = vmatpush3.xpose.msra.mxu1 %v107_v0  ;;  %v84_v4 = vld [vmem:[#allocation3 + $0x40] sm:$0xff]  ;;  %v102_v7 = vld [vmem:[#allocation6 + $0x50] sm:$0xff]  ;;  %v101_v8 = vld [vmem:[#allocation6 + $0x48] sm:$0xff]  ;;  %s519_s21 = scalar_lea.vmem %s342_s1, 2048  ;;  %p524_p11 = scmp.lt.s32.totalorder %s342_s1, %s342_s1 }
  0x1f   :  { %388 = vmatprep.subr.mxu0 %v106_v1  ;;  %443 = vmatprep.subr.mxu1 %v106_v1  ;;  %v104_v5 = vld [vmem:[#allocation6 + $0x60] sm:$0xff]  ;;  %v99_v10 = vld [vmem:[#allocation6 + $0x38] sm:$0xff]  ;;  %v98_v11 = vld [vmem:[#allocation6 + $0x30] sm:$0xff]  ;;  %p520_p10 = scmp.ne.s32.totalorder %s342_s1, %s519_s21  ;;  %p525_p12 = scmp.lt.s32.totalorder %s519_s21, %s519_s21 }
  0x20   :  { %418 = vmatprep.mubr.f32.mxu0 %v76_v3  ;;  %430 = vmatprep.mubr.f32.mxu1 %v84_v4  ;;  %v100_v9 = vld [vmem:[#allocation6 + $0x40] sm:$0xff]  ;;  %v97_v12 = vld [vmem:[#allocation6 + $0x28] sm:$0xff]  ;;  %v95_v14 = vld [vmem:[#allocation6 + $0x18] sm:$0xff] }
  0x21   :  { %v96_v13 = vld [vmem:[#allocation6 + $0x20] sm:$0xff]  ;;  %v94_v15 = vld [vmem:[#allocation6 + $0x10] sm:$0xff]  ;;  %v93_v16 = vld [vmem:[#allocation6 + $0x8] sm:$0xff]  ;;  %p526_p13 = por %p525_p12, %p524_p11 }
  0x22   :  { %389 = vmatpush3.xpose.msra.mxu0 %v106_v1  ;;  %459 = vmatpush3.xpose.msra.mxu1 %v106_v1  ;;  %v92_v17 = vld [vmem:[#allocation6] sm:$0xff]  ;;  %v77_v18 = vld [vmem:[#allocation3 + $0x8] sm:$0xff]  ;;  %v78_v20 = vld [vmem:[#allocation3 + $0x10] sm:$0xff] }
  0x23   :  { %390 = vmatprep.subr.mxu0 %v105_v2  ;;  %444 = vmatprep.subr.mxu1 %v105_v2  ;;  %v85_v19 = vld [vmem:[#allocation3 + $0x48] sm:$0xff]  ;;  %v86_v21 = vld [vmem:[#allocation3 + $0x50] sm:$0xff]  ;;  %v79_v22 = vld [vmem:[#allocation3 + $0x18] sm:$0xff]  ;;  %p527_p0 = pnand %p526_p13, %p520_p10 }
  0x24   :  { %v87_v23 = vld [vmem:[#allocation3 + $0x58] sm:$0xff]  ;;  %v80_v24 = vld [vmem:[#allocation3 + $0x20] sm:$0xff]  ;;  %v81_v26 = vld [vmem:[#allocation3 + $0x28] sm:$0xff] }
  0x25   :  { %v88_v25 = vld [vmem:[#allocation3 + $0x60] sm:$0xff]  ;;  %v89_v27 = vld [vmem:[#allocation3 + $0x68] sm:$0xff]  ;;  %v82_v28 = vld [vmem:[#allocation3 + $0x30] sm:$0xff] }
  0x26   :  { %391 = vmatpush3.xpose.msra.mxu0 %v105_v2  ;;  %460 = vmatpush3.xpose.msra.mxu1 %v105_v2  ;;  %v90_v29 = vld [vmem:[#allocation3 + $0x70] sm:$0xff]  ;;  %v83_v30 = vld [vmem:[#allocation3 + $0x38] sm:$0xff] }
  0x27   :  { %392 = vmatprep.subr.mxu0 %v104_v5  ;;  %445 = vmatprep.subr.mxu1 %v104_v5  ;;  %v91_v31 = vld [vmem:[#allocation3 + $0x78] sm:$0xff] }
  0x2a   :  { %393 = vmatpush3.xpose.msra.mxu0 %v104_v5  ;;  %461 = vmatpush3.xpose.msra.mxu1 %v104_v5 }
  0x2b   :  { %394 = vmatprep.subr.mxu0 %v103_v6  ;;  %446 = vmatprep.subr.mxu1 %v103_v6 }
  0x2e   :  { %395 = vmatpush3.xpose.msra.mxu0 %v103_v6  ;;  %462 = vmatpush3.xpose.msra.mxu1 %v103_v6 }
  0x2f   :  { %396 = vmatprep.subr.mxu0 %v102_v7  ;;  %447 = vmatprep.subr.mxu1 %v102_v7 }
  0x32   :  { %397 = vmatpush3.xpose.msra.mxu0 %v102_v7  ;;  %463 = vmatpush3.xpose.msra.mxu1 %v102_v7 }
  0x33   :  { %398 = vmatprep.subr.mxu0 %v101_v8  ;;  %448 = vmatprep.subr.mxu1 %v101_v8 }
  0x36   :  { %399 = vmatpush3.xpose.msra.mxu0 %v101_v8  ;;  %464 = vmatpush3.xpose.msra.mxu1 %v101_v8 }
  0x37   :  { %400 = vmatprep.subr.mxu0 %v100_v9  ;;  %449 = vmatprep.subr.mxu1 %v100_v9 }
  0x3a   :  { %401 = vmatpush3.xpose.msra.mxu0 %v100_v9  ;;  %465 = vmatpush3.xpose.msra.mxu1 %v100_v9 }
  0x3b   :  { %402 = vmatprep.subr.mxu0 %v99_v10  ;;  %450 = vmatprep.subr.mxu1 %v99_v10 }
  0x3e   :  { %403 = vmatpush3.xpose.msra.mxu0 %v99_v10  ;;  %466 = vmatpush3.xpose.msra.mxu1 %v99_v10 }
  0x3f   :  { %404 = vmatprep.subr.mxu0 %v98_v11  ;;  %451 = vmatprep.subr.mxu1 %v98_v11 }
  0x42   :  { %405 = vmatpush3.xpose.msra.mxu0 %v98_v11  ;;  %467 = vmatpush3.xpose.msra.mxu1 %v98_v11 }
  0x43   :  { %406 = vmatprep.subr.mxu0 %v97_v12  ;;  %452 = vmatprep.subr.mxu1 %v97_v12 }
  0x46   :  { %407 = vmatpush3.xpose.msra.mxu0 %v97_v12  ;;  %468 = vmatpush3.xpose.msra.mxu1 %v97_v12 }
  0x47   :  { %408 = vmatprep.subr.mxu0 %v96_v13  ;;  %453 = vmatprep.subr.mxu1 %v96_v13 }
  0x4a   :  { %409 = vmatpush3.xpose.msra.mxu0 %v96_v13  ;;  %469 = vmatpush3.xpose.msra.mxu1 %v96_v13 }
  0x4b   :  { %410 = vmatprep.subr.mxu0 %v95_v14  ;;  %454 = vmatprep.subr.mxu1 %v95_v14 }
  0x4e   :  { %411 = vmatpush3.xpose.msra.mxu0 %v95_v14  ;;  %470 = vmatpush3.xpose.msra.mxu1 %v95_v14 }
  0x4f   :  { %412 = vmatprep.subr.mxu0 %v94_v15  ;;  %455 = vmatprep.subr.mxu1 %v94_v15 }
  0x52   :  { %413 = vmatpush3.xpose.msra.mxu0 %v94_v15  ;;  %471 = vmatpush3.xpose.msra.mxu1 %v94_v15 }
  0x53   :  { %414 = vmatprep.subr.mxu0 %v93_v16  ;;  %456 = vmatprep.subr.mxu1 %v93_v16 }
  0x56   :  { %415 = vmatpush3.xpose.msra.mxu0 %v93_v16  ;;  %472 = vmatpush3.xpose.msra.mxu1 %v93_v16 }
  0x57   :  { %416 = vmatprep.subr.mxu0 %v92_v17  ;;  %457 = vmatprep.subr.mxu1 %v92_v17 }
  0x5a   :  { %417 = vmatpush3.xpose.msra.mxu0 %v92_v17  ;;  %473 = vmatpush3.xpose.msra.mxu1 %v92_v17 }
  0x5d   :  { %419 = vmatmul.mubr.f32.vlgmr.msra.gmra.mxu0 %v77_v18  ;;  %431 = vmatmul.mubr.f32.vlgmr.msra.gmra.mxu1 %v85_v19 }
  0x5e   :  { %421 = vmatprep.mubr.f32.mxu0 %v78_v20  ;;  %433 = vmatprep.mubr.f32.mxu1 %v86_v21 }
  0x61   :  { %422 = vmatmul.mubr.f32.gmra.mxu0 %v79_v22  ;;  %434 = vmatmul.mubr.f32.gmra.mxu1 %v87_v23 }
  0x62   :  { %424 = vmatprep.mubr.f32.mxu0 %v80_v24  ;;  %436 = vmatprep.mubr.f32.mxu1 %v88_v25 }
  0x65   :  { %425 = vmatmul.mubr.f32.gmra.mxu0 %v81_v26  ;;  %437 = vmatmul.mubr.f32.gmra.mxu1 %v89_v27 }
  0x66   :  { %427 = vmatprep.mubr.f32.mxu0 %v82_v28  ;;  %439 = vmatprep.mubr.f32.mxu1 %v90_v29 }
  0x69   :  { %428 = vmatmul.mubr.f32.gmra.mxu0 %v83_v30  ;;  %440 = vmatmul.mubr.f32.gmra.mxu1 %v91_v31 }
 0x11d   :  { %v420_v32 = vpop.f32.mrf.mxu0  ;;  %v432_v33 = vpop.f32.mrf.mxu1 }
 0x11e   :  { %v305_v34 = vmul.f32 100.0, %v420_v32  ;;  %v313_v35 = vmul.f32 100.0, %v432_v33 }
 0x11f   :  { %v174_v36 = vpop.f32.mrf.mxu0  ;;  %v214_v37 = vpop.f32.mrf.mxu1 }
 0x120   :  { %321 = vst [vmem:[#allocation8 + $0x8] sm:$0xff] %v305_v34  ;;  %329 = vst [vmem:[#allocation8 + $0x48] sm:$0xff] %v313_v35  ;;  %v304_v38 = vmul.f32 100.0, %v174_v36  ;;  %v312_v39 = vmul.f32 100.0, %v214_v37 }
 0x121   :  { %v423_v40 = vpop.f32.mrf.mxu0  ;;  %v435_v41 = vpop.f32.mrf.mxu1 }
 0x122   :  { %320 = vst [vmem:[#allocation8] sm:$0xff] %v304_v38  ;;  %328 = vst [vmem:[#allocation8 + $0x40] sm:$0xff] %v312_v39  ;;  %v307_v42 = vmul.f32 100.0, %v423_v40  ;;  %v315_v43 = vmul.f32 100.0, %v435_v41 }
 0x123   :  { %v184_v44 = vpop.f32.mrf.mxu0  ;;  %v224_v45 = vpop.f32.mrf.mxu1 }
 0x124   :  { %323 = vst [vmem:[#allocation8 + $0x18] sm:$0xff] %v307_v42  ;;  %331 = vst [vmem:[#allocation8 + $0x58] sm:$0xff] %v315_v43  ;;  %v306_v46 = vmul.f32 100.0, %v184_v44  ;;  %v314_v47 = vmul.f32 100.0, %v224_v45 }
 0x125   :  { %v426_v48 = vpop.f32.mrf.mxu0  ;;  %v438_v49 = vpop.f32.mrf.mxu1 }
 0x126   :  { %322 = vst [vmem:[#allocation8 + $0x10] sm:$0xff] %v306_v46  ;;  %330 = vst [vmem:[#allocation8 + $0x50] sm:$0xff] %v314_v47  ;;  %v309_v50 = vmul.f32 100.0, %v426_v48  ;;  %v317_v51 = vmul.f32 100.0, %v438_v49 }
 0x127   :  { %v194_v52 = vpop.f32.mrf.mxu0  ;;  %v234_v53 = vpop.f32.mrf.mxu1 }
 0x128   :  { %325 = vst [vmem:[#allocation8 + $0x28] sm:$0xff] %v309_v50  ;;  %333 = vst [vmem:[#allocation8 + $0x68] sm:$0xff] %v317_v51  ;;  %v308_v54 = vmul.f32 100.0, %v194_v52  ;;  %v316_v55 = vmul.f32 100.0, %v234_v53 }
 0x129   :  { %v429_v56 = vpop.f32.mrf.mxu0  ;;  %v441_v57 = vpop.f32.mrf.mxu1 }
 0x12a   :  { %324 = vst [vmem:[#allocation8 + $0x20] sm:$0xff] %v308_v54  ;;  %332 = vst [vmem:[#allocation8 + $0x60] sm:$0xff] %v316_v55  ;;  %v311_v58 = vmul.f32 100.0, %v429_v56  ;;  %v319_v59 = vmul.f32 100.0, %v441_v57 }
 0x12b   :  { %v204_v60 = vpop.f32.mrf.mxu0  ;;  %v244_v61 = vpop.f32.mrf.mxu1 }
 0x12c   :  { %327 = vst [vmem:[#allocation8 + $0x38] sm:$0xff] %v311_v58  ;;  %335 = vst [vmem:[#allocation8 + $0x78] sm:$0xff] %v319_v59  ;;  %v310_v62 = vmul.f32 100.0, %v204_v60  ;;  %v318_v63 = vmul.f32 100.0, %v244_v61 }
 0x12e   :  { %326 = vst [vmem:[#allocation8 + $0x30] sm:$0xff] %v310_v62  ;;  %334 = vst [vmem:[#allocation8 + $0x70] sm:$0xff] %v318_v63 }
 0x12f   :  { %530 = shalt.err (!%p527_p0)
}
 0x130   :  { %347 = dma.vmem_to_hbm [thread:$0]  %s342_s1, 2048, %s585_s2, [#allocation5], %s546_s12, %s546_s12, %s547_s13  }
 0x131   :  { %543 = dma.done.wait [#allocation5], 2048  }
 0x132   :  { %544 = vsyncadd [#allocation5], 4294965248 }
 0x133   :  { %351 = vsyncpa [#allocation4], 1 }
 0x134   :  { %352 = vsyncpa [#allocation7], 1 }
 0x135   :  { %353 = vsyncpa [#allocation5], 1 }

</bundles_post_ra>
